<compile_context>
chip_gen: v6e
topology: v6e:2x2x1
jax: 0.10.0
libtpu: 0.0.40
codegen_flags: <defaults>
</compile_context>

<pallas_src>
import functools
import math

import numpy as np

import jax
import jax.numpy as jnp
from jax.experimental import pallas as pl
from jax.experimental.pallas import tpu as pltpu


def _round_up(x, m):
    return ((x + m - 1) // m) * m


def cnn_block_kernel(H, W, KH, KW, C1p, C2p,
                     x_ref, w1_ref, b1_ref, w2_ref, b2_ref,
                     bns_ref, bnb_ref, mask_ref, taps1_ref, taps2_ref,
                     o_ref, col1_ref, col2_ref):
    # x_ref:     (C1p, L)            L = Nb*HW, samples folded along lanes
    # w1_ref:    (C2p, KH*KW*C1p)    conv1 weight, rows ordered (kh, kw, cin)
    # b1_ref:    (C2p, 1)            conv1 bias (zero-padded)
    # w2_ref:    (C2p, KH*KW*C2p)    conv2 weight
    # b2_ref:    (C2p, 1)            conv2 bias (zero-padded)
    # bns_ref:   (C1p, 1)            BN per-channel scale  gamma / sqrt(var + eps)
    # bnb_ref:   (C1p, 1)            BN per-channel shift  beta - mean * scale
    # mask_ref:  (C2p, L)            dropout2d scaled keep mask, pre-expanded
    # taps*_ref: (KH*KW*Cp, L)       boundary-validity masks, pre-expanded to im2col rows
    # o_ref:     (C2p, L)
    # col*_ref:  VMEM scratch for the two im2col operands
    L = x_ref.shape[-1]
    ph, pw = KH // 2, KW // 2

    def build_im2col(data, taps_ref_, col_ref, C):
        # data: (C, L).  Fill col_ref (KH*KW*C, L) with lane-rotated, boundary-masked
        # copies at sublane-aligned row offsets (C is a multiple of 8).  The mask chunk
        # is full-shape (C, L): plain VPU multiply, no sublane broadcast.
        for kh in range(KH):
            for kw in range(KW):
                off = (kh - ph) * W + (kw - pw)
                rows = pl.ds((kh * KW + kw) * C, C)
                if off == 0:
                    col_ref[rows, :] = data                       # center tap: copy
                else:
                    shifted = pltpu.roll(data, (-off) % L, 1)     # XLU lane rotation
                    col_ref[rows, :] = shifted * taps_ref_[rows, :]

    # --- BatchNorm folded to per-channel scale/shift (channels on sublanes) ---
    xb = x_ref[...] * bns_ref[...] + bnb_ref[...]                 # (C1p, L)

    # --- conv1: one deep-K matmul (C2p, K1) @ (K1, L), + bias, ReLU ---
    build_im2col(xb, taps1_ref, col1_ref, C1p)
    c1 = jnp.dot(w1_ref[...], col1_ref[...],
                 preferred_element_type=jnp.float32) + b1_ref[...]
    c1 = jnp.maximum(c1, 0.0)                                     # (C2p, L)

    # --- conv2: one deep-K matmul (C2p, K2) @ (K2, L), + bias, ReLU ---
    build_im2col(c1, taps2_ref, col2_ref, C2p)
    c2 = jnp.dot(w2_ref[...], col2_ref[...],
                 preferred_element_type=jnp.float32) + b2_ref[...]
    c2 = jnp.maximum(c2, 0.0)                                     # (C2p, L)

    # --- dropout2d: pre-expanded per-(sample, channel) scaled keep mask ---
    o_ref[...] = (c2 * mask_ref[...]).astype(o_ref.dtype)


@functools.partial(jax.jit, static_argnames=("eps", "num_blocks"))
def _cnn_block_impl(x_nchw, w1_oihw, b1, w2_oihw, b2, gamma, beta, drop_mask,
                    *, eps, num_blocks):
    N, Cin, H, W = x_nchw.shape
    Cmid, _, KH, KW = w1_oihw.shape
    HW = H * W
    assert N % num_blocks == 0
    Nb = N // num_blocks
    Lb = Nb * HW
    C1p = _round_up(Cin, 8)       # sublane-group alignment for the conv1 im2col
    C2p = _round_up(Cmid, 8)
    K1 = KH * KW * C1p
    K2 = KH * KW * C2p
    ph, pw = KH // 2, KW // 2

    # --- BatchNorm2d training-mode batch stats, single fused pass ---
    mean = jnp.mean(x_nchw, axis=(0, 2, 3))
    var = jnp.mean(x_nchw * x_nchw, axis=(0, 2, 3)) - mean * mean
    bn_scale = gamma / jnp.sqrt(var + eps)
    bn_shift = beta - mean * bn_scale
    bn_scale = jnp.pad(bn_scale, (0, C1p - Cin)).reshape(C1p, 1)   # padded rows -> 0
    bn_shift = jnp.pad(bn_shift, (0, C1p - Cin)).reshape(C1p, 1)

    # --- Input: NCHW -> (C1p, N*HW), samples folded onto the lane axis ---
    x = jnp.transpose(x_nchw.reshape(N, Cin, HW), (1, 0, 2)).reshape(Cin, N * HW)
    x = jnp.pad(x, ((0, C1p - Cin), (0, 0)))

    # --- Conv weights OIHW -> (Cout_pad, KH*KW*Cin_pad), im2col row order (kh,kw,c) ---
    w1m = jnp.pad(jnp.transpose(w1_oihw, (0, 2, 3, 1)),
                  ((0, C2p - Cmid), (0, 0), (0, 0), (0, C1p - Cin))).reshape(C2p, K1)
    w2m = jnp.pad(jnp.transpose(w2_oihw, (0, 2, 3, 1)),
                  ((0, C2p - Cmid), (0, 0), (0, 0), (0, C2p - Cmid))).reshape(C2p, K2)
    b1p = jnp.pad(b1, (0, C2p - Cmid)).reshape(C2p, 1)
    b2p = jnp.pad(b2, (0, C2p - Cmid)).reshape(C2p, 1)

    # --- Static boundary-validity masks, pre-expanded to the full im2col row layout.
    # Cross-sample wraparound of the in-kernel roll only lands on masked positions,
    # and the mask pattern is identical per sample, so tiling along lanes is correct.
    hh, ww = np.meshgrid(np.arange(H), np.arange(W), indexing="ij")
    taps_np = np.zeros((KH * KW, HW), np.float32)
    for kh in range(KH):
        for kw in range(KW):
            dh, dw = kh - ph, kw - pw
            valid = ((hh + dh >= 0) & (hh + dh < H) &
                     (ww + dw >= 0) & (ww + dw < W))
            taps_np[kh * KW + kw] = valid.reshape(HW).astype(np.float32)
    taps1 = jnp.asarray(np.tile(np.repeat(taps_np, C1p, axis=0), (1, Nb)))
    taps2 = jnp.asarray(np.tile(np.repeat(taps_np, C2p, axis=0), (1, Nb)))

    # --- Dropout2d scaled keep mask pre-expanded to (C2p, N*HW) ---
    maskf = jnp.pad(drop_mask, ((0, 0), (0, C2p - Cmid)))            # (N, C2p)
    maskf = jnp.repeat(jnp.transpose(maskf)[:, :, None], HW, axis=2).reshape(C2p, N * HW)

    out = pl.pallas_call(
        functools.partial(cnn_block_kernel, H, W, KH, KW, C1p, C2p),
        out_shape=jax.ShapeDtypeStruct((C2p, N * HW), jnp.float32),
        grid_spec=pltpu.PrefetchScalarGridSpec(
            num_scalar_prefetch=0,
            grid=(num_blocks,),
            in_specs=[
                pl.BlockSpec((C1p, Lb), lambda g: (0, g)),        # x
                pl.BlockSpec((C2p, K1), lambda g: (0, 0)),        # w1
                pl.BlockSpec((C2p, 1), lambda g: (0, 0)),         # b1
                pl.BlockSpec((C2p, K2), lambda g: (0, 0)),        # w2
                pl.BlockSpec((C2p, 1), lambda g: (0, 0)),         # b2
                pl.BlockSpec((C1p, 1), lambda g: (0, 0)),         # bn scale
                pl.BlockSpec((C1p, 1), lambda g: (0, 0)),         # bn shift
                pl.BlockSpec((C2p, Lb), lambda g: (0, g)),        # dropout mask
                pl.BlockSpec((K1, Lb), lambda g: (0, 0)),         # taps for conv1
                pl.BlockSpec((K2, Lb), lambda g: (0, 0)),         # taps for conv2
            ],
            out_specs=pl.BlockSpec((C2p, Lb), lambda g: (0, g)),
            scratch_shapes=[
                pltpu.VMEM((K1, Lb), jnp.float32),                # conv1 im2col operand
                pltpu.VMEM((K2, Lb), jnp.float32),                # conv2 im2col operand
            ],
        ),
        compiler_params=pltpu.CompilerParams(
            dimension_semantics=("parallel",)),
    )(x, w1m, b1p, w2m, b2p, bn_scale, bn_shift, maskf, taps1, taps2)

    # (C2p, N*HW) -> (N, Cmid, H, W)
    out = jnp.transpose(out.reshape(C2p, N, HW), (1, 0, 2))[:, :Cmid]
    return out.reshape(N, Cmid, H, W)


def cnn_block_forward(x_nchw, w1_oihw, b1, w2_oihw, b2, gamma, beta, drop_mask,
                      eps=1e-5, num_blocks=None):
    """x_nchw: (N, Cin, H, W). Returns (N, Cmid, H, W) in NCHW, like PyTorch."""
    if num_blocks is None:
        # v7x has 2 TensorCores per chip -> two 'parallel' blocks; v5e/v6e have one TC,
        # where a single wide block minimizes per-grid-step pipeline overhead.
        try:
            kind = jax.devices()[0].device_kind.lower()
        except Exception:
            kind = ""
        num_blocks = 2 if ("v7" in kind and x_nchw.shape[0] % 2 == 0
                           and x_nchw.shape[0] >= 2) else 1
    return _cnn_block_impl(x_nchw, w1_oihw, b1, w2_oihw, b2, gamma, beta, drop_mask,
                           eps=eps, num_blocks=num_blocks)


if __name__ == "__main__":
    key = jax.random.PRNGKey(0)
    N, Cin, H, W = 2, 4, 16, 16        # CNNBlock(input_channels=4, internal_channels=8)
    Cmid = 8
    KH = KW = 3
    keys = jax.random.split(key, 6)

    # Deterministic synthetic parameters (shapes per nn.Conv2d / nn.BatchNorm2d init).
    x_nchw = jax.random.normal(keys[0], (N, Cin, H, W), jnp.float32)
    bound1 = 1.0 / math.sqrt(Cin * KH * KW)
    w1_oihw = jax.random.uniform(keys[1], (Cmid, Cin, KH, KW), jnp.float32, -bound1, bound1)
    b1 = jax.random.uniform(keys[2], (Cmid,), jnp.float32, -bound1, bound1)
    bound2 = 1.0 / math.sqrt(Cmid * KH * KW)
    w2_oihw = jax.random.uniform(keys[3], (Cmid, Cmid, KH, KW), jnp.float32, -bound2, bound2)
    b2 = jax.random.uniform(keys[4], (Cmid,), jnp.float32, -bound2, bound2)
    gamma = jnp.ones((Cin,), jnp.float32)   # BatchNorm2d weight init
    beta = jnp.zeros((Cin,), jnp.float32)   # BatchNorm2d bias init

    # F.dropout2d(p=0.3) training mode: drop whole channels per sample, scale by 1/(1-p).
    # TODO(synk): PyTorch's RNG stream is not reproduced; mask is generated with JAX RNG.
    p = 0.3
    keep = jax.random.bernoulli(keys[5], 1.0 - p, (N, Cmid)).astype(jnp.float32)
    drop_mask = keep / (1.0 - p)

    out = cnn_block_forward(x_nchw, w1_oihw, b1, w2_oihw, b2, gamma, beta, drop_mask)
    out = jax.block_until_ready(out)

    # Plain-JAX NCHW reference (same BN batch stats and dropout mask).
    eps = 1e-5
    mean = jnp.mean(x_nchw, axis=(0, 2, 3))
    var = jnp.mean((x_nchw - mean[None, :, None, None]) ** 2, axis=(0, 2, 3))
    xb = ((x_nchw - mean[None, :, None, None]) / jnp.sqrt(var + eps)[None, :, None, None]
          * gamma[None, :, None, None] + beta[None, :, None, None])
    dn = ("NCHW", "OIHW", "NCHW")
    c1 = jax.lax.conv_general_dilated(xb, w1_oihw, (1, 1), "SAME", dimension_numbers=dn)
    c1 = jnp.maximum(c1 + b1[None, :, None, None], 0.0)
    c2 = jax.lax.conv_general_dilated(c1, w2_oihw, (1, 1), "SAME", dimension_numbers=dn)
    c2 = jnp.maximum(c2 + b2[None, :, None, None], 0.0)
    ref = c2 * drop_mask[:, :, None, None]
    assert jnp.allclose(out, ref, atol=1e-4, rtol=1e-4), "mismatch vs reference"

    print("KERNEL_OK")
</pallas_src>

<mosaic_0001>
module attributes {stable_mosaic.version = 11 : i64} {
  func.func @cnn_block_kernel(%arg0: i32, %arg1: memref<8x512xf32, #tpu.memory_space<vmem>>, %arg2: memref<8x72xf32, #tpu.memory_space<vmem>>, %arg3: memref<8x1xf32, #tpu.memory_space<vmem>>, %arg4: memref<8x72xf32, #tpu.memory_space<vmem>>, %arg5: memref<8x1xf32, #tpu.memory_space<vmem>>, %arg6: memref<8x1xf32, #tpu.memory_space<vmem>>, %arg7: memref<8x1xf32, #tpu.memory_space<vmem>>, %arg8: memref<8x512xf32, #tpu.memory_space<vmem>>, %arg9: memref<72x512xf32, #tpu.memory_space<vmem>>, %arg10: memref<72x512xf32, #tpu.memory_space<vmem>>, %arg11: memref<8x512xf32, #tpu.memory_space<vmem>>, %arg12: memref<72x512xf32, #tpu.memory_space<vmem>>, %arg13: memref<72x512xf32, #tpu.memory_space<vmem>>) attributes {dimension_semantics = [#tpu.dimension_semantics<parallel>], iteration_bounds = array<i64: 1>, scalar_prefetch = 0 : i64, scratch_operands = 2 : i64, tpu.core_type = #tpu.core_type<tc>, window_params = [{transform_indices = @transform_0, window_bounds = array<i64: 8, 512>}, {pipeline_mode = #tpu.pipeline_mode<synchronous>, transform_indices = @transform_1, window_bounds = array<i64: 8, 72>}, {pipeline_mode = #tpu.pipeline_mode<synchronous>, transform_indices = @transform_2, window_bounds = array<i64: 8, 1>}, {pipeline_mode = #tpu.pipeline_mode<synchronous>, transform_indices = @transform_3, window_bounds = array<i64: 8, 72>}, {pipeline_mode = #tpu.pipeline_mode<synchronous>, transform_indices = @transform_4, window_bounds = array<i64: 8, 1>}, {pipeline_mode = #tpu.pipeline_mode<synchronous>, transform_indices = @transform_5, window_bounds = array<i64: 8, 1>}, {pipeline_mode = #tpu.pipeline_mode<synchronous>, transform_indices = @transform_6, window_bounds = array<i64: 8, 1>}, {transform_indices = @transform_7, window_bounds = array<i64: 8, 512>}, {pipeline_mode = #tpu.pipeline_mode<synchronous>, transform_indices = @transform_8, window_bounds = array<i64: 72, 512>}, {pipeline_mode = #tpu.pipeline_mode<synchronous>, transform_indices = @transform_9, window_bounds = array<i64: 72, 512>}, {transform_indices = @transform_10, window_bounds = array<i64: 8, 512>}]} {
    %c0 = arith.constant 0 : index
    %c0_0 = arith.constant 0 : index
    %0 = vector.load %arg1[%c0, %c0_0] : memref<8x512xf32, #tpu.memory_space<vmem>>, vector<8x512xf32>
    %c0_1 = arith.constant 0 : index
    %c0_2 = arith.constant 0 : index
    %1 = vector.load %arg6[%c0_1, %c0_2] : memref<8x1xf32, #tpu.memory_space<vmem>>, vector<8x1xf32>
    %2 = vector.broadcast %1 : vector<8x1xf32> to vector<8x512xf32>
    %3 = arith.mulf %0, %2 : vector<8x512xf32>
    %c0_3 = arith.constant 0 : index
    %c0_4 = arith.constant 0 : index
    %4 = vector.load %arg7[%c0_3, %c0_4] : memref<8x1xf32, #tpu.memory_space<vmem>>, vector<8x1xf32>
    %5 = vector.broadcast %4 : vector<8x1xf32> to vector<8x512xf32>
    %6 = arith.addf %3, %5 : vector<8x512xf32>
    %c17_i32 = arith.constant 17 : i32
    %7 = tpu.dynamic_rotate %6 by %c17_i32 dim 1 : vector<8x512xf32>, i32 -> vector<8x512xf32>
    %c0_5 = arith.constant 0 : index
    %c0_6 = arith.constant 0 : index
    %8 = vector.load %arg9[%c0_5, %c0_6] : memref<72x512xf32, #tpu.memory_space<vmem>>, vector<8x512xf32>
    %9 = arith.mulf %7, %8 : vector<8x512xf32>
    %c0_7 = arith.constant 0 : index
    %c0_8 = arith.constant 0 : index
    %10 = vector.load %arg12[%c0_7, %c0_8] : memref<72x512xf32, #tpu.memory_space<vmem>>, vector<8x512xf32>
    tpu.vector_store %arg12[%c0_7, %c0_8], %9 {strides = array<i32>} : memref<72x512xf32, #tpu.memory_space<vmem>>, vector<8x512xf32>,
    %c16_i32 = arith.constant 16 : i32
    %11 = tpu.dynamic_rotate %6 by %c16_i32 dim 1 : vector<8x512xf32>, i32 -> vector<8x512xf32>
    %c8 = arith.constant 8 : index
    %c0_9 = arith.constant 0 : index
    %12 = vector.load %arg9[%c8, %c0_9] : memref<72x512xf32, #tpu.memory_space<vmem>>, vector<8x512xf32>
    %13 = arith.mulf %11, %12 : vector<8x512xf32>
    %c8_10 = arith.constant 8 : index
    %c0_11 = arith.constant 0 : index
    %14 = vector.load %arg12[%c8_10, %c0_11] : memref<72x512xf32, #tpu.memory_space<vmem>>, vector<8x512xf32>
    tpu.vector_store %arg12[%c8_10, %c0_11], %13 {strides = array<i32>} : memref<72x512xf32, #tpu.memory_space<vmem>>, vector<8x512xf32>,
    %c15_i32 = arith.constant 15 : i32
    %15 = tpu.dynamic_rotate %6 by %c15_i32 dim 1 : vector<8x512xf32>, i32 -> vector<8x512xf32>
    %c16 = arith.constant 16 : index
    %c0_12 = arith.constant 0 : index
    %16 = vector.load %arg9[%c16, %c0_12] : memref<72x512xf32, #tpu.memory_space<vmem>>, vector<8x512xf32>
    %17 = arith.mulf %15, %16 : vector<8x512xf32>
    %c16_13 = arith.constant 16 : index
    %c0_14 = arith.constant 0 : index
    %18 = vector.load %arg12[%c16_13, %c0_14] : memref<72x512xf32, #tpu.memory_space<vmem>>, vector<8x512xf32>
    tpu.vector_store %arg12[%c16_13, %c0_14], %17 {strides = array<i32>} : memref<72x512xf32, #tpu.memory_space<vmem>>, vector<8x512xf32>,
    %c1_i32 = arith.constant 1 : i32
    %19 = tpu.dynamic_rotate %6 by %c1_i32 dim 1 : vector<8x512xf32>, i32 -> vector<8x512xf32>
    %c24 = arith.constant 24 : index
    %c0_15 = arith.constant 0 : index
    %20 = vector.load %arg9[%c24, %c0_15] : memref<72x512xf32, #tpu.memory_space<vmem>>, vector<8x512xf32>
    %21 = arith.mulf %19, %20 : vector<8x512xf32>
    %c24_16 = arith.constant 24 : index
    %c0_17 = arith.constant 0 : index
    %22 = vector.load %arg12[%c24_16, %c0_17] : memref<72x512xf32, #tpu.memory_space<vmem>>, vector<8x512xf32>
    tpu.vector_store %arg12[%c24_16, %c0_17], %21 {strides = array<i32>} : memref<72x512xf32, #tpu.memory_space<vmem>>, vector<8x512xf32>,
    %c32 = arith.constant 32 : index
    %c0_18 = arith.constant 0 : index
    %23 = vector.load %arg12[%c32, %c0_18] : memref<72x512xf32, #tpu.memory_space<vmem>>, vector<8x512xf32>
    tpu.vector_store %arg12[%c32, %c0_18], %6 {strides = array<i32>} : memref<72x512xf32, #tpu.memory_space<vmem>>, vector<8x512xf32>,
    %c511_i32 = arith.constant 511 : i32
    %24 = tpu.dynamic_rotate %6 by %c511_i32 dim 1 : vector<8x512xf32>, i32 -> vector<8x512xf32>
    %c40 = arith.constant 40 : index
    %c0_19 = arith.constant 0 : index
    %25 = vector.load %arg9[%c40, %c0_19] : memref<72x512xf32, #tpu.memory_space<vmem>>, vector<8x512xf32>
    %26 = arith.mulf %24, %25 : vector<8x512xf32>
    %c40_20 = arith.constant 40 : index
    %c0_21 = arith.constant 0 : index
    %27 = vector.load %arg12[%c40_20, %c0_21] : memref<72x512xf32, #tpu.memory_space<vmem>>, vector<8x512xf32>
    tpu.vector_store %arg12[%c40_20, %c0_21], %26 {strides = array<i32>} : memref<72x512xf32, #tpu.memory_space<vmem>>, vector<8x512xf32>,
    %c497_i32 = arith.constant 497 : i32
    %28 = tpu.dynamic_rotate %6 by %c497_i32 dim 1 : vector<8x512xf32>, i32 -> vector<8x512xf32>
    %c48 = arith.constant 48 : index
    %c0_22 = arith.constant 0 : index
    %29 = vector.load %arg9[%c48, %c0_22] : memref<72x512xf32, #tpu.memory_space<vmem>>, vector<8x512xf32>
    %30 = arith.mulf %28, %29 : vector<8x512xf32>
    %c48_23 = arith.constant 48 : index
    %c0_24 = arith.constant 0 : index
    %31 = vector.load %arg12[%c48_23, %c0_24] : memref<72x512xf32, #tpu.memory_space<vmem>>, vector<8x512xf32>
    tpu.vector_store %arg12[%c48_23, %c0_24], %30 {strides = array<i32>} : memref<72x512xf32, #tpu.memory_space<vmem>>, vector<8x512xf32>,
    %c496_i32 = arith.constant 496 : i32
    %32 = tpu.dynamic_rotate %6 by %c496_i32 dim 1 : vector<8x512xf32>, i32 -> vector<8x512xf32>
    %c56 = arith.constant 56 : index
    %c0_25 = arith.constant 0 : index
    %33 = vector.load %arg9[%c56, %c0_25] : memref<72x512xf32, #tpu.memory_space<vmem>>, vector<8x512xf32>
    %34 = arith.mulf %32, %33 : vector<8x512xf32>
    %c56_26 = arith.constant 56 : index
    %c0_27 = arith.constant 0 : index
    %35 = vector.load %arg12[%c56_26, %c0_27] : memref<72x512xf32, #tpu.memory_space<vmem>>, vector<8x512xf32>
    tpu.vector_store %arg12[%c56_26, %c0_27], %34 {strides = array<i32>} : memref<72x512xf32, #tpu.memory_space<vmem>>, vector<8x512xf32>,
    %c495_i32 = arith.constant 495 : i32
    %36 = tpu.dynamic_rotate %6 by %c495_i32 dim 1 : vector<8x512xf32>, i32 -> vector<8x512xf32>
    %c64 = arith.constant 64 : index
    %c0_28 = arith.constant 0 : index
    %37 = vector.load %arg9[%c64, %c0_28] : memref<72x512xf32, #tpu.memory_space<vmem>>, vector<8x512xf32>
    %38 = arith.mulf %36, %37 : vector<8x512xf32>
    %c64_29 = arith.constant 64 : index
    %c0_30 = arith.constant 0 : index
    %39 = vector.load %arg12[%c64_29, %c0_30] : memref<72x512xf32, #tpu.memory_space<vmem>>, vector<8x512xf32>
    tpu.vector_store %arg12[%c64_29, %c0_30], %38 {strides = array<i32>} : memref<72x512xf32, #tpu.memory_space<vmem>>, vector<8x512xf32>,
    %c0_31 = arith.constant 0 : index
    %c0_32 = arith.constant 0 : index
    %40 = vector.load %arg2[%c0_31, %c0_32] : memref<8x72xf32, #tpu.memory_space<vmem>>, vector<8x72xf32>
    %c0_33 = arith.constant 0 : index
    %c0_34 = arith.constant 0 : index
    %41 = vector.load %arg12[%c0_33, %c0_34] : memref<72x512xf32, #tpu.memory_space<vmem>>, vector<72x512xf32>
    %cst = arith.constant dense<0.000000e+00> : vector<8x512xf32>
    %42 = tpu.matmul %40, %41, %cst {dimension_numbers = #tpu.dot_dimension_numbers<[1], [0], [0], [1], [0, 0, 1, 1], [], []>} : vector<8x72xf32>, vector<72x512xf32>, vector<8x512xf32> -> vector<8x512xf32>
    %c0_35 = arith.constant 0 : index
    %c0_36 = arith.constant 0 : index
    %43 = vector.load %arg3[%c0_35, %c0_36] : memref<8x1xf32, #tpu.memory_space<vmem>>, vector<8x1xf32>
    %44 = vector.broadcast %43 : vector<8x1xf32> to vector<8x512xf32>
    %45 = arith.addf %42, %44 : vector<8x512xf32>
    %cst_37 = arith.constant 0.000000e+00 : f32
    %46 = vector.broadcast %cst_37 : f32 to vector<8x512xf32>
    %47 = arith.maximumf %45, %46 : vector<8x512xf32>
    %c17_i32_38 = arith.constant 17 : i32
    %48 = tpu.dynamic_rotate %47 by %c17_i32_38 dim 1 : vector<8x512xf32>, i32 -> vector<8x512xf32>
    %c0_39 = arith.constant 0 : index
    %c0_40 = arith.constant 0 : index
    %49 = vector.load %arg10[%c0_39, %c0_40] : memref<72x512xf32, #tpu.memory_space<vmem>>, vector<8x512xf32>
    %50 = arith.mulf %48, %49 : vector<8x512xf32>
    %c0_41 = arith.constant 0 : index
    %c0_42 = arith.constant 0 : index
    %51 = vector.load %arg13[%c0_41, %c0_42] : memref<72x512xf32, #tpu.memory_space<vmem>>, vector<8x512xf32>
    tpu.vector_store %arg13[%c0_41, %c0_42], %50 {strides = array<i32>} : memref<72x512xf32, #tpu.memory_space<vmem>>, vector<8x512xf32>,
    %c16_i32_43 = arith.constant 16 : i32
    %52 = tpu.dynamic_rotate %47 by %c16_i32_43 dim 1 : vector<8x512xf32>, i32 -> vector<8x512xf32>
    %c8_44 = arith.constant 8 : index
    %c0_45 = arith.constant 0 : index
    %53 = vector.load %arg10[%c8_44, %c0_45] : memref<72x512xf32, #tpu.memory_space<vmem>>, vector<8x512xf32>
    %54 = arith.mulf %52, %53 : vector<8x512xf32>
    %c8_46 = arith.constant 8 : index
    %c0_47 = arith.constant 0 : index
    %55 = vector.load %arg13[%c8_46, %c0_47] : memref<72x512xf32, #tpu.memory_space<vmem>>, vector<8x512xf32>
    tpu.vector_store %arg13[%c8_46, %c0_47], %54 {strides = array<i32>} : memref<72x512xf32, #tpu.memory_space<vmem>>, vector<8x512xf32>,
    %c15_i32_48 = arith.constant 15 : i32
    %56 = tpu.dynamic_rotate %47 by %c15_i32_48 dim 1 : vector<8x512xf32>, i32 -> vector<8x512xf32>
    %c16_49 = arith.constant 16 : index
    %c0_50 = arith.constant 0 : index
    %57 = vector.load %arg10[%c16_49, %c0_50] : memref<72x512xf32, #tpu.memory_space<vmem>>, vector<8x512xf32>
    %58 = arith.mulf %56, %57 : vector<8x512xf32>
    %c16_51 = arith.constant 16 : index
    %c0_52 = arith.constant 0 : index
    %59 = vector.load %arg13[%c16_51, %c0_52] : memref<72x512xf32, #tpu.memory_space<vmem>>, vector<8x512xf32>
    tpu.vector_store %arg13[%c16_51, %c0_52], %58 {strides = array<i32>} : memref<72x512xf32, #tpu.memory_space<vmem>>, vector<8x512xf32>,
    %c1_i32_53 = arith.constant 1 : i32
    %60 = tpu.dynamic_rotate %47 by %c1_i32_53 dim 1 : vector<8x512xf32>, i32 -> vector<8x512xf32>
    %c24_54 = arith.constant 24 : index
    %c0_55 = arith.constant 0 : index
    %61 = vector.load %arg10[%c24_54, %c0_55] : memref<72x512xf32, #tpu.memory_space<vmem>>, vector<8x512xf32>
    %62 = arith.mulf %60, %61 : vector<8x512xf32>
    %c24_56 = arith.constant 24 : index
    %c0_57 = arith.constant 0 : index
    %63 = vector.load %arg13[%c24_56, %c0_57] : memref<72x512xf32, #tpu.memory_space<vmem>>, vector<8x512xf32>
    tpu.vector_store %arg13[%c24_56, %c0_57], %62 {strides = array<i32>} : memref<72x512xf32, #tpu.memory_space<vmem>>, vector<8x512xf32>,
    %c32_58 = arith.constant 32 : index
    %c0_59 = arith.constant 0 : index
    %64 = vector.load %arg13[%c32_58, %c0_59] : memref<72x512xf32, #tpu.memory_space<vmem>>, vector<8x512xf32>
    tpu.vector_store %arg13[%c32_58, %c0_59], %47 {strides = array<i32>} : memref<72x512xf32, #tpu.memory_space<vmem>>, vector<8x512xf32>,
    %c511_i32_60 = arith.constant 511 : i32
    %65 = tpu.dynamic_rotate %47 by %c511_i32_60 dim 1 : vector<8x512xf32>, i32 -> vector<8x512xf32>
    %c40_61 = arith.constant 40 : index
    %c0_62 = arith.constant 0 : index
    %66 = vector.load %arg10[%c40_61, %c0_62] : memref<72x512xf32, #tpu.memory_space<vmem>>, vector<8x512xf32>
    %67 = arith.mulf %65, %66 : vector<8x512xf32>
    %c40_63 = arith.constant 40 : index
    %c0_64 = arith.constant 0 : index
    %68 = vector.load %arg13[%c40_63, %c0_64] : memref<72x512xf32, #tpu.memory_space<vmem>>, vector<8x512xf32>
    tpu.vector_store %arg13[%c40_63, %c0_64], %67 {strides = array<i32>} : memref<72x512xf32, #tpu.memory_space<vmem>>, vector<8x512xf32>,
    %c497_i32_65 = arith.constant 497 : i32
    %69 = tpu.dynamic_rotate %47 by %c497_i32_65 dim 1 : vector<8x512xf32>, i32 -> vector<8x512xf32>
    %c48_66 = arith.constant 48 : index
    %c0_67 = arith.constant 0 : index
    %70 = vector.load %arg10[%c48_66, %c0_67] : memref<72x512xf32, #tpu.memory_space<vmem>>, vector<8x512xf32>
    %71 = arith.mulf %69, %70 : vector<8x512xf32>
    %c48_68 = arith.constant 48 : index
    %c0_69 = arith.constant 0 : index
    %72 = vector.load %arg13[%c48_68, %c0_69] : memref<72x512xf32, #tpu.memory_space<vmem>>, vector<8x512xf32>
    tpu.vector_store %arg13[%c48_68, %c0_69], %71 {strides = array<i32>} : memref<72x512xf32, #tpu.memory_space<vmem>>, vector<8x512xf32>,
    %c496_i32_70 = arith.constant 496 : i32
    %73 = tpu.dynamic_rotate %47 by %c496_i32_70 dim 1 : vector<8x512xf32>, i32 -> vector<8x512xf32>
    %c56_71 = arith.constant 56 : index
    %c0_72 = arith.constant 0 : index
    %74 = vector.load %arg10[%c56_71, %c0_72] : memref<72x512xf32, #tpu.memory_space<vmem>>, vector<8x512xf32>
    %75 = arith.mulf %73, %74 : vector<8x512xf32>
    %c56_73 = arith.constant 56 : index
    %c0_74 = arith.constant 0 : index
    %76 = vector.load %arg13[%c56_73, %c0_74] : memref<72x512xf32, #tpu.memory_space<vmem>>, vector<8x512xf32>
    tpu.vector_store %arg13[%c56_73, %c0_74], %75 {strides = array<i32>} : memref<72x512xf32, #tpu.memory_space<vmem>>, vector<8x512xf32>,
    %c495_i32_75 = arith.constant 495 : i32
    %77 = tpu.dynamic_rotate %47 by %c495_i32_75 dim 1 : vector<8x512xf32>, i32 -> vector<8x512xf32>
    %c64_76 = arith.constant 64 : index
    %c0_77 = arith.constant 0 : index
    %78 = vector.load %arg10[%c64_76, %c0_77] : memref<72x512xf32, #tpu.memory_space<vmem>>, vector<8x512xf32>
    %79 = arith.mulf %77, %78 : vector<8x512xf32>
    %c64_78 = arith.constant 64 : index
    %c0_79 = arith.constant 0 : index
    %80 = vector.load %arg13[%c64_78, %c0_79] : memref<72x512xf32, #tpu.memory_space<vmem>>, vector<8x512xf32>
    tpu.vector_store %arg13[%c64_78, %c0_79], %79 {strides = array<i32>} : memref<72x512xf32, #tpu.memory_space<vmem>>, vector<8x512xf32>,
    %c0_80 = arith.constant 0 : index
    %c0_81 = arith.constant 0 : index
    %81 = vector.load %arg4[%c0_80, %c0_81] : memref<8x72xf32, #tpu.memory_space<vmem>>, vector<8x72xf32>
    %c0_82 = arith.constant 0 : index
    %c0_83 = arith.constant 0 : index
    %82 = vector.load %arg13[%c0_82, %c0_83] : memref<72x512xf32, #tpu.memory_space<vmem>>, vector<72x512xf32>
    %cst_84 = arith.constant dense<0.000000e+00> : vector<8x512xf32>
    %83 = tpu.matmul %81, %82, %cst_84 {dimension_numbers = #tpu.dot_dimension_numbers<[1], [0], [0], [1], [0, 0, 1, 1], [], []>} : vector<8x72xf32>, vector<72x512xf32>, vector<8x512xf32> -> vector<8x512xf32>
    %c0_85 = arith.constant 0 : index
    %c0_86 = arith.constant 0 : index
    %84 = vector.load %arg5[%c0_85, %c0_86] : memref<8x1xf32, #tpu.memory_space<vmem>>, vector<8x1xf32>
    %85 = vector.broadcast %84 : vector<8x1xf32> to vector<8x512xf32>
    %86 = arith.addf %83, %85 : vector<8x512xf32>
    %cst_87 = arith.constant 0.000000e+00 : f32
    %87 = vector.broadcast %cst_87 : f32 to vector<8x512xf32>
    %88 = arith.maximumf %86, %87 : vector<8x512xf32>
    %c0_88 = arith.constant 0 : index
    %c0_89 = arith.constant 0 : index
    %89 = vector.load %arg8[%c0_88, %c0_89] : memref<8x512xf32, #tpu.memory_space<vmem>>, vector<8x512xf32>
    %90 = arith.mulf %88, %89 : vector<8x512xf32>
    %c0_90 = arith.constant 0 : index
    %c0_91 = arith.constant 0 : index
    %91 = vector.load %arg11[%c0_90, %c0_91] : memref<8x512xf32, #tpu.memory_space<vmem>>, vector<8x512xf32>
    tpu.vector_store %arg11[%c0_90, %c0_91], %90 {strides = array<i32>} : memref<8x512xf32, #tpu.memory_space<vmem>>, vector<8x512xf32>,
    return
  }
  func.func @transform_0(%arg0: i32) -> (i32, i32) {
    %c0_i32 = arith.constant 0 : i32
    %c0_i32_0 = arith.constant 0 : i32
    return %c0_i32, %arg0 : i32, i32
  }
  func.func @transform_1(%arg0: i32) -> (i32, i32) {
    %c0_i32 = arith.constant 0 : i32
    %c0_i32_0 = arith.constant 0 : i32
    %c0_i32_1 = arith.constant 0 : i32
    return %c0_i32, %c0_i32_0 : i32, i32
  }
  func.func @transform_2(%arg0: i32) -> (i32, i32) {
    %c0_i32 = arith.constant 0 : i32
    %c0_i32_0 = arith.constant 0 : i32
    %c0_i32_1 = arith.constant 0 : i32
    return %c0_i32, %c0_i32_0 : i32, i32
  }
  func.func @transform_3(%arg0: i32) -> (i32, i32) {
    %c0_i32 = arith.constant 0 : i32
    %c0_i32_0 = arith.constant 0 : i32
    %c0_i32_1 = arith.constant 0 : i32
    return %c0_i32, %c0_i32_0 : i32, i32
  }
  func.func @transform_4(%arg0: i32) -> (i32, i32) {
    %c0_i32 = arith.constant 0 : i32
    %c0_i32_0 = arith.constant 0 : i32
    %c0_i32_1 = arith.constant 0 : i32
    return %c0_i32, %c0_i32_0 : i32, i32
  }
  func.func @transform_5(%arg0: i32) -> (i32, i32) {
    %c0_i32 = arith.constant 0 : i32
    %c0_i32_0 = arith.constant 0 : i32
    %c0_i32_1 = arith.constant 0 : i32
    return %c0_i32, %c0_i32_0 : i32, i32
  }
  func.func @transform_6(%arg0: i32) -> (i32, i32) {
    %c0_i32 = arith.constant 0 : i32
    %c0_i32_0 = arith.constant 0 : i32
    %c0_i32_1 = arith.constant 0 : i32
    return %c0_i32, %c0_i32_0 : i32, i32
  }
  func.func @transform_7(%arg0: i32) -> (i32, i32) {
    %c0_i32 = arith.constant 0 : i32
    %c0_i32_0 = arith.constant 0 : i32
    return %c0_i32, %arg0 : i32, i32
  }
  func.func @transform_8(%arg0: i32) -> (i32, i32) {
    %c0_i32 = arith.constant 0 : i32
    %c0_i32_0 = arith.constant 0 : i32
    %c0_i32_1 = arith.constant 0 : i32
    return %c0_i32, %c0_i32_0 : i32, i32
  }
  func.func @transform_9(%arg0: i32) -> (i32, i32) {
    %c0_i32 = arith.constant 0 : i32
    %c0_i32_0 = arith.constant 0 : i32
    %c0_i32_1 = arith.constant 0 : i32
    return %c0_i32, %c0_i32_0 : i32, i32
  }
  func.func @transform_10(%arg0: i32) -> (i32, i32) {
    %c0_i32 = arith.constant 0 : i32
    %c0_i32_0 = arith.constant 0 : i32
    return %c0_i32, %arg0 : i32, i32
  }
}

</mosaic_0001>

<bundles_post_ra>
// kernel: _cnn_block_impl.1
= control target key start
LH: loop header
LB: loop body
LE: loop exit
PB: predicated region body
PF: predicated region fallthrough
CT: control target
= control target key end

     0   :  { %v878_v0 = vmov 0   ;;  %s880_s24 = smov 112   ;;  %s881_s25 = smov 113   ;;  %v887_v17 = vmov 0.0   ;;  %v67_v19 = vlaneseq  ;;  %vm308_vm8 = vcmask 588800   ;;  %s1487_s5 = inlined_call_operand.vmem [shape: f32[8,1], index: 5, kind: input, shape index: {}]   ;;  %s1488_s6 = inlined_call_operand.vmem [shape: f32[8,1], index: 6, kind: input, shape index: {}]   ;;  %s1489_s0 = inlined_call_operand.vmem [shape: f32[8,512], index: 0, kind: input, shape index: {}]   ;;  %s1490_s2 = inlined_call_operand.vmem [shape: f32[8,1], index: 2, kind: input, shape index: {}]   ;;  %s1491_s8 = inlined_call_operand.vmem [shape: f32[72,512], index: 8, kind: input, shape index: {}, may-alias: {8,9}]   ;;  %s1492_s1 = inlined_call_operand.vmem [shape: f32[8,72], index: 1, kind: input, shape index: {}]   ;;  %s1493_s4 = inlined_call_operand.vmem [shape: f32[8,1], index: 4, kind: input, shape index: {}]   ;;  %s1494_s9 = inlined_call_operand.vmem [shape: f32[72,512], index: 9, kind: input, shape index: {}, may-alias: {8,9}]   ;;  %s1495_s3 = inlined_call_operand.vmem [shape: f32[8,72], index: 3, kind: input, shape index: {}]   ;;  %s1496_s7 = inlined_call_operand.vmem [shape: f32[8,512], index: 7, kind: input, shape index: {}]   ;;  %s1497_s10 = inlined_call_operand.vmem [shape: f32[8,512], index: 10, kind: output, shape index: {}]  }
   0x1   :  { %876 = vset.pattern.permute.xlu0 %v878_v0  ;;  %v39_v1 = vld [vmem:[%s1487_s5] sm:$0xff]  ;;  %877 = vset.pattern.permute.xlu1 %v878_v0  ;;  %v37_v5 = vld [vmem:[%s1489_s0 + $0x10] sm:$0xff]  ;;  %v36_v8 = vld [vmem:[%s1489_s0 + $0x8] sm:$0xff]  ;;  %s883_s26 = smov 1   ;;  %s884_s27 = smov 15  }
   0x2   :  { %42 = vperm.xlu0 %876, %v39_v1   ;;  %v49_v2 = vld [vmem:[%s1488_s6] sm:$0xff]  ;;  %s879_s6 = smov 111   ;;  %v38_v13 = vld [vmem:[%s1489_s0 + $0x18] sm:$0xff]  ;;  %s885_s28 = smov 16   ;;  %376 = vmatprep.mubr.f32.mxu0 %v887_v17  ;;  %v1038_v20 = vand.u32 127, %v67_v19  ;;  %v254_v23 = vld [vmem:[%s1491_s8 + $0x108] sm:$0xff] }
   0x3   :  { %v35_v4 = vld [vmem:[%s1489_s0] sm:$0xff]  ;;  %s882_s0 = smov 127   ;;  %s886_s29 = smov 17   ;;  %447 = vmatprep.mubr.f32.mxu1 %v887_v17  ;;  %v256_v31 = vld [vmem:[%s1491_s8 + $0x118] sm:$0xff]  ;;  %v255_v32 = vld [vmem:[%s1491_s8 + $0x110] sm:$0xff] }
   0x4   :  { %v302_v18 = vld [vmem:[%s1490_s2] sm:$0xff]  ;;  %vm248_vm0 = vcmp.lt.s32.totalorder %v1038_v20, 111  ;;  %vm223_vm1 = vcmp.lt.s32.totalorder %v1038_v20, 112  ;;  %v229_v40 = vld [vmem:[%s1491_s8 + $0xe8] sm:$0xff]  ;;  %v230_v47 = vld [vmem:[%s1491_s8 + $0xf0] sm:$0xff]  ;;  %vm198_vm2 = vcmp.lt.s32.totalorder %v1038_v20, 113 }
   0x5   :  { %v253_v24 = vld [vmem:[%s1491_s8 + $0x100] sm:$0xff]  ;;  %v231_v48 = vld [vmem:[%s1491_s8 + $0xf8] sm:$0xff]  ;;  %v204_v56 = vld [vmem:[%s1491_s8 + $0xc8] sm:$0xff]  ;;  %vm173_vm3 = vcmp.lt.s32.totalorder %v1038_v20, 127  ;;  %vm144_vm4 = vcmp.lt.s32.totalorder %v1038_v20, 1  ;;  %vm119_vm5 = vcmp.lt.s32.totalorder %v1038_v20, 15 }
   0x6   :  { %52 = vperm.xlu0 %876, %v49_v2   ;;  %v228_v39 = vld [vmem:[%s1491_s8 + $0xe0] sm:$0xff]  ;;  %v205_v63 = vld [vmem:[%s1491_s8 + $0xd0] sm:$0xff]  ;;  %v206_v0 = vld [vmem:[%s1491_s8 + $0xd8] sm:$0xff]  ;;  %vm94_vm6 = vcmp.lt.s32.totalorder %v1038_v20, 16  ;;  %vm69_vm7 = vcmp.lt.s32.totalorder %v1038_v20, 17 }
   0x7   :  { %v203_v55 = vld [vmem:[%s1491_s8 + $0xc0] sm:$0xff] }
   0x8   :  { %v846_v20 = vld [vmem:[%s1496_s7] sm:$0xff] }
  0x7d   :  { %v43_v3 = vpop.permute.xlu0 %42 }
  0x7e   :  { %v45_v6 = vmul.f32 %v43_v3, %v35_v4  ;;  %v47_v7 = vmul.f32 %v43_v3, %v37_v5  ;;  %v46_v12 = vmul.f32 %v43_v3, %v36_v8  ;;  %v48_v15 = vmul.f32 %v43_v3, %v38_v13  ;;  %v179_v8 = vld [vmem:[%s1491_s8 + $0xa8] sm:$0xff] }
  0x81   :  { %v53_v9 = vpop.permute.xlu0 %52 }
  0x82   :  { %v958_v10 = vadd.f32 %v53_v9, %v45_v6  ;;  %v960_v11 = vadd.f32 %v53_v9, %v47_v7  ;;  %v969_v14 = vadd.f32 %v53_v9, %v46_v12  ;;  %v975_v16 = vadd.f32 %v53_v9, %v48_v15  ;;  %v178_v7 = vld [vmem:[%s1491_s8 + $0xa0] sm:$0xff] }
  0x84   :  { %244 = vrot.lane.b32.xlu0 %v960_v11, %s879_s6  ;;  %240 = vrot.lane.b32.xlu1 %v958_v10, %s879_s6 }
  0x88   :  { %215 = vrot.lane.b32.xlu0 %v958_v10, %s880_s24  ;;  %242 = vrot.lane.b32.xlu1 %v969_v14, %s879_s6 }
  0x8c   :  { %219 = vrot.lane.b32.xlu0 %v960_v11, %s880_s24  ;;  %246 = vrot.lane.b32.xlu1 %v975_v16, %s879_s6 }
  0x90   :  { %190 = vrot.lane.b32.xlu0 %v958_v10, %s881_s25  ;;  %217 = vrot.lane.b32.xlu1 %v969_v14, %s880_s24 }
  0x94   :  { %194 = vrot.lane.b32.xlu0 %v960_v11, %s881_s25  ;;  %221 = vrot.lane.b32.xlu1 %v975_v16, %s880_s24 }
  0x98   :  { %165 = vrot.lane.b32.xlu0 %v958_v10, %s882_s0  ;;  %192 = vrot.lane.b32.xlu1 %v969_v14, %s881_s25 }
  0x9c   :  { %169 = vrot.lane.b32.xlu0 %v960_v11, %s882_s0  ;;  %196 = vrot.lane.b32.xlu1 %v975_v16, %s881_s25 }
  0xa0   :  { %136 = vrot.lane.b32.xlu0 %v958_v10, %s883_s26  ;;  %167 = vrot.lane.b32.xlu1 %v969_v14, %s882_s0 }
  0xa4   :  { %140 = vrot.lane.b32.xlu0 %v960_v11, %s883_s26  ;;  %171 = vrot.lane.b32.xlu1 %v975_v16, %s882_s0 }
  0xa8   :  { %111 = vrot.lane.b32.xlu0 %v958_v10, %s884_s27  ;;  %138 = vrot.lane.b32.xlu1 %v969_v14, %s883_s26 }
  0xac   :  { %115 = vrot.lane.b32.xlu0 %v960_v11, %s884_s27  ;;  %142 = vrot.lane.b32.xlu1 %v975_v16, %s883_s26 }
  0xb0   :  { %86 = vrot.lane.b32.xlu0 %v958_v10, %s885_s28  ;;  %113 = vrot.lane.b32.xlu1 %v969_v14, %s884_s27 }
  0xb4   :  { %90 = vrot.lane.b32.xlu0 %v960_v11, %s885_s28  ;;  %117 = vrot.lane.b32.xlu1 %v975_v16, %s884_s27 }
  0xb8   :  { %59 = vrot.lane.b32.xlu0 %v958_v10, %s886_s29  ;;  %88 = vrot.lane.b32.xlu1 %v969_v14, %s885_s28 }
  0xbc   :  { %63 = vrot.lane.b32.xlu0 %v960_v11, %s886_s29  ;;  %92 = vrot.lane.b32.xlu1 %v975_v16, %s885_s28 }
  0xc0   :  { %305 = vperm.xlu0 %876, %v302_v18   ;;  %61 = vrot.lane.b32.xlu1 %v969_v14, %s886_s29 }
  0xc4   :  { %65 = vrot.lane.b32.xlu1 %v975_v16, %s886_s29 }
  0xf6   :  { %v245_v21 = vpop.permute.xlu0 %244  ;;  %v241_v22 = vpop.permute.xlu1 %240 }
  0xfa   :  { %v216_v25 = vpop.permute.xlu0 %215  ;;  %v243_v26 = vpop.permute.xlu1 %242 }
  0xfb   :  { %v251_v27 = vsel %vm248_vm0, %v241_v22, %v243_v26  ;;  %v250_v28 = vsel %vm248_vm0, %v243_v26, %v245_v21 }
  0xfc   :  { %v258_v29 = vmul.f32 %v254_v23, %v250_v28  ;;  %v257_v30 = vmul.f32 %v253_v24, %v251_v27 }
  0xfe   :  { %v220_v33 = vpop.permute.xlu0 %219  ;;  %326 = vmatprep.subr.mxu0 %v258_v29  ;;  %v247_v34 = vpop.permute.xlu1 %246  ;;  %v150_v29 = vld [vmem:[%s1491_s8 + $0x68] sm:$0xff] }
  0xff   :  { %v249_v35 = vsel %vm248_vm0, %v245_v21, %v247_v34  ;;  %327 = vmatpush1.msra.mxu0 %v257_v30  ;;  %v252_v36 = vsel %vm248_vm0, %v247_v34, %v241_v22  ;;  %v180_v21 = vld [vmem:[%s1491_s8 + $0xb0] sm:$0xff]  ;;  %v181_v22 = vld [vmem:[%s1491_s8 + $0xb8] sm:$0xff] }
 0x100   :  { %v260_v37 = vmul.f32 %v256_v31, %v252_v36  ;;  %v259_v38 = vmul.f32 %v255_v32, %v249_v35  ;;  %v151_v34 = vld [vmem:[%s1491_s8 + $0x70] sm:$0xff] }
 0x102   :  { %v191_v41 = vpop.permute.xlu0 %190  ;;  %397 = vmatprep.subr.mxu1 %v260_v37  ;;  %v218_v42 = vpop.permute.xlu1 %217 }
 0x103   :  { %v225_v43 = vsel %vm223_vm1, %v218_v42, %v220_v33  ;;  %v226_v44 = vsel %vm223_vm1, %v216_v25, %v218_v42  ;;  %398 = vmatpush1.msra.mxu1 %v259_v38 }
 0x104   :  { %v232_v45 = vmul.f32 %v228_v39, %v226_v44  ;;  %v233_v46 = vmul.f32 %v229_v40, %v225_v43 }
 0x106   :  { %v195_v49 = vpop.permute.xlu0 %194  ;;  %328 = vmatprep.subr.mxu0 %v233_v46  ;;  %v222_v50 = vpop.permute.xlu1 %221  ;;  %v124_v46 = vld [vmem:[%s1491_s8 + $0x40] sm:$0xff] }
 0x107   :  { %v224_v51 = vsel %vm223_vm1, %v220_v33, %v222_v50  ;;  %v227_v52 = vsel %vm223_vm1, %v222_v50, %v216_v25  ;;  %329 = vmatpush1.msra.mxu0 %v232_v45 }
 0x108   :  { %v234_v53 = vmul.f32 %v230_v47, %v224_v51  ;;  %v235_v54 = vmul.f32 %v231_v48, %v227_v52  ;;  %v127_v47 = vld [vmem:[%s1491_s8 + $0x58] sm:$0xff]  ;;  %v126_v48 = vld [vmem:[%s1491_s8 + $0x50] sm:$0xff] }
 0x10a   :  { %v166_v57 = vpop.permute.xlu0 %165  ;;  %399 = vmatprep.subr.mxu1 %v235_v54  ;;  %v193_v58 = vpop.permute.xlu1 %192 }
 0x10b   :  { %v200_v59 = vsel %vm198_vm2, %v193_v58, %v195_v49  ;;  %v201_v60 = vsel %vm198_vm2, %v191_v41, %v193_v58  ;;  %400 = vmatpush1.msra.mxu1 %v234_v53 }
 0x10c   :  { %v207_v61 = vmul.f32 %v203_v55, %v201_v60  ;;  %v208_v62 = vmul.f32 %v204_v56, %v200_v59 }
 0x10e   :  { %v170_v1 = vpop.permute.xlu0 %169  ;;  %330 = vmatprep.subr.mxu0 %v208_v62  ;;  %v197_v2 = vpop.permute.xlu1 %196  ;;  %v102_v62 = vld [vmem:[%s1491_s8 + $0x38] sm:$0xff] }
 0x10f   :  { %v199_v3 = vsel %vm198_vm2, %v195_v49, %v197_v2  ;;  %v202_v4 = vsel %vm198_vm2, %v197_v2, %v191_v41  ;;  %331 = vmatpush1.msra.mxu0 %v207_v61  ;;  %v125_v41 = vld [vmem:[%s1491_s8 + $0x48] sm:$0xff]  ;;  %v99_v61 = vld [vmem:[%s1491_s8 + $0x20] sm:$0xff] }
 0x110   :  { %v209_v5 = vmul.f32 %v205_v63, %v199_v3  ;;  %v210_v6 = vmul.f32 %v206_v0, %v202_v4  ;;  %v101_v63 = vld [vmem:[%s1491_s8 + $0x30] sm:$0xff] }
 0x112   :  { %v137_v9 = vpop.permute.xlu0 %136  ;;  %401 = vmatprep.subr.mxu1 %v210_v6  ;;  %v168_v12 = vpop.permute.xlu1 %167 }
 0x113   :  { %v175_v13 = vsel %vm173_vm3, %v168_v12, %v170_v1  ;;  %v176_v15 = vsel %vm173_vm3, %v166_v57, %v168_v12  ;;  %402 = vmatpush1.msra.mxu1 %v209_v5 }
 0x114   :  { %v182_v18 = vmul.f32 %v178_v7, %v176_v15  ;;  %v183_v19 = vmul.f32 %v179_v8, %v175_v13  ;;  %v75_v8 = vld [vmem:[%s1491_s8 + $0x8] sm:$0xff] }
 0x116   :  { %v141_v23 = vpop.permute.xlu0 %140  ;;  %332 = vmatprep.subr.mxu0 %v183_v19  ;;  %v172_v24 = vpop.permute.xlu1 %171  ;;  %v77_v19 = vld [vmem:[%s1491_s8 + $0x18] sm:$0xff] }
 0x117   :  { %v174_v25 = vsel %vm173_vm3, %v170_v1, %v172_v24  ;;  %v177_v26 = vsel %vm173_vm3, %v172_v24, %v166_v57  ;;  %333 = vmatpush1.msra.mxu0 %v182_v18  ;;  %v100_v57 = vld [vmem:[%s1491_s8 + $0x28] sm:$0xff]  ;;  %v74_v18 = vld [vmem:[%s1491_s8] sm:$0xff] }
 0x118   :  { %v184_v27 = vmul.f32 %v180_v21, %v174_v25  ;;  %v185_v28 = vmul.f32 %v181_v22, %v177_v26  ;;  %334 = vmatprep.subr.mxu0 %v969_v14  ;;  %v152_v14 = vld [vmem:[%s1491_s8 + $0x78] sm:$0xff]  ;;  %v76_v21 = vld [vmem:[%s1491_s8 + $0x10] sm:$0xff] }
 0x119   :  { %335 = vmatpush1.msra.mxu0 %v958_v10  ;;  %v149_v10 = vld [vmem:[%s1491_s8 + $0x60] sm:$0xff] }
 0x11a   :  { %v112_v30 = vpop.permute.xlu0 %111  ;;  %403 = vmatprep.subr.mxu1 %v185_v28  ;;  %v139_v31 = vpop.permute.xlu1 %138  ;;  %v265_v28 = vld [vmem:[%s1492_s1] sm:$0xff] }
 0x11b   :  { %v147_v32 = vsel %vm144_vm4, %v137_v9, %v139_v31  ;;  %404 = vmatpush1.msra.mxu1 %v184_v27  ;;  %v146_v35 = vsel %vm144_vm4, %v139_v31, %v141_v23 }
 0x11c   :  { %v154_v33 = vmul.f32 %v150_v29, %v147_v32  ;;  %405 = vmatprep.subr.mxu1 %v975_v16  ;;  %v155_v40 = vmul.f32 %v151_v34, %v146_v35 }
 0x11d   :  { %406 = vmatpush1.msra.mxu1 %v960_v11 }
 0x11e   :  { %v116_v36 = vpop.permute.xlu0 %115  ;;  %336 = vmatprep.subr.mxu0 %v154_v33  ;;  %v143_v16 = vpop.permute.xlu1 %142 }
 0x11f   :  { %v145_v11 = vsel %vm144_vm4, %v141_v23, %v143_v16  ;;  %v148_v37 = vsel %vm144_vm4, %v143_v16, %v137_v9 }
 0x120   :  { %v153_v38 = vmul.f32 %v149_v10, %v148_v37  ;;  %v156_v39 = vmul.f32 %v152_v14, %v145_v11 }
 0x122   :  { %337 = vmatpush1.msra.mxu0 %v153_v38  ;;  %407 = vmatprep.subr.mxu1 %v156_v39  ;;  %v114_v42 = vpop.permute.xlu1 %113  ;;  %v87_v43 = vpop.permute.xlu0 %86  ;;  %v691_v38 = vld [vmem:[%s1493_s4] sm:$0xff] }
 0x123   :  { %v122_v44 = vsel %vm119_vm5, %v112_v30, %v114_v42  ;;  %408 = vmatpush1.msra.mxu1 %v155_v40  ;;  %v121_v49 = vsel %vm119_vm5, %v114_v42, %v116_v36  ;;  %v642_v42 = vld [vmem:[%s1494_s9 + $0x100] sm:$0xff] }
 0x124   :  { %v129_v45 = vmul.f32 %v125_v41, %v122_v44  ;;  %v130_v55 = vmul.f32 %v126_v48, %v121_v49  ;;  %v643_v41 = vld [vmem:[%s1494_s9 + $0x108] sm:$0xff] }
 0x126   :  { %338 = vmatprep.subr.mxu0 %v129_v45  ;;  %v118_v50 = vpop.permute.xlu1 %117  ;;  %v91_v56 = vpop.permute.xlu0 %90 }
 0x127   :  { %v120_v51 = vsel %vm119_vm5, %v116_v36, %v118_v50  ;;  %v123_v52 = vsel %vm119_vm5, %v118_v50, %v112_v30 }
 0x128   :  { %v128_v53 = vmul.f32 %v124_v46, %v123_v52  ;;  %v131_v54 = vmul.f32 %v127_v47, %v120_v51  ;;  %v644_v46 = vld [vmem:[%s1494_s9 + $0x110] sm:$0xff]  ;;  %v645_v47 = vld [vmem:[%s1494_s9 + $0x118] sm:$0xff] }
 0x12a   :  { %339 = vmatpush1.msra.mxu0 %v128_v53  ;;  %409 = vmatprep.subr.mxu1 %v131_v54  ;;  %v89_v58 = vpop.permute.xlu1 %88  ;;  %v60_v2 = vpop.permute.xlu0 %59 }
 0x12b   :  { %v97_v59 = vsel %vm94_vm6, %v87_v43, %v89_v58  ;;  %410 = vmatpush1.msra.mxu1 %v130_v55  ;;  %v96_v0 = vsel %vm94_vm6, %v89_v58, %v91_v56  ;;  %v618_v58 = vld [vmem:[%s1494_s9 + $0xe0] sm:$0xff] }
 0x12c   :  { %v104_v60 = vmul.f32 %v100_v57, %v97_v59  ;;  %v105_v7 = vmul.f32 %v101_v63, %v96_v0  ;;  %v619_v57 = vld [vmem:[%s1494_s9 + $0xe8] sm:$0xff]  ;;  %v621_v63 = vld [vmem:[%s1494_s9 + $0xf8] sm:$0xff] }
 0x12e   :  { %340 = vmatprep.subr.mxu0 %v104_v60  ;;  %v93_v1 = vpop.permute.xlu1 %92  ;;  %v64_v15 = vpop.permute.xlu0 %63 }
 0x12f   :  { %v95_v3 = vsel %vm94_vm6, %v91_v56, %v93_v1  ;;  %v98_v4 = vsel %vm94_vm6, %v93_v1, %v87_v43 }
 0x130   :  { %v103_v5 = vmul.f32 %v99_v61, %v98_v4  ;;  %v106_v6 = vmul.f32 %v102_v62, %v95_v3  ;;  %v620_v62 = vld [vmem:[%s1494_s9 + $0xf0] sm:$0xff] }
 0x132   :  { %341 = vmatpush1.msra.mxu0 %v103_v5  ;;  %411 = vmatprep.subr.mxu1 %v106_v6  ;;  %v62_v9 = vpop.permute.xlu1 %61 }
 0x133   :  { %v72_v12 = vsel %vm69_vm7, %v60_v2, %v62_v9  ;;  %412 = vmatpush1.msra.mxu1 %v105_v7  ;;  %v71_v22 = vsel %vm69_vm7, %v62_v9, %v64_v15  ;;  %v595_v9 = vld [vmem:[%s1494_s9 + $0xc8] sm:$0xff] }
 0x134   :  { %v79_v13 = vmul.f32 %v75_v8, %v72_v12  ;;  %v80_v29 = vmul.f32 %v76_v21, %v71_v22  ;;  %v594_v12 = vld [vmem:[%s1494_s9 + $0xc0] sm:$0xff]  ;;  %v597_v21 = vld [vmem:[%s1494_s9 + $0xd8] sm:$0xff] }
 0x136   :  { %342 = vmatprep.subr.mxu0 %v79_v13  ;;  %v66_v23 = vpop.permute.xlu1 %65 }
 0x137   :  { %v70_v24 = vsel %vm69_vm7, %v64_v15, %v66_v23  ;;  %v73_v25 = vsel %vm69_vm7, %v66_v23, %v60_v2 }
 0x138   :  { %v78_v26 = vmul.f32 %v74_v18, %v73_v25  ;;  %v81_v27 = vmul.f32 %v77_v19, %v70_v24  ;;  %v596_v19 = vld [vmem:[%s1494_s9 + $0xd0] sm:$0xff] }
 0x13a   :  { %343 = vmatpush1.msra.mxu0 %v78_v26  ;;  %413 = vmatprep.subr.mxu1 %v81_v27 }
 0x13b   :  { %862 = vmatmul.mubr.msk.f32.vlgmr.msra.gmra.mxu0 %vm308_vm8, %v265_v28  ;;  %414 = vmatpush1.msra.mxu1 %v80_v29  ;;  %v306_v30 = vpop.permute.xlu0 %305 }
 0x13c   :  { %863 = vmatmul.mubr.msk.f32.vlgmr.msra.gmra.mxu1 %vm308_vm8, %v265_v28  ;;  %764 = vmatprep.mubr.f32.mxu0 %v887_v17 }
 0x13d   :  { %835 = vmatprep.mubr.f32.mxu1 %v887_v17 }
 0x1fb   :  { %v378_v31 = vpop.f32.mrf.mxu0 }
 0x1fc   :  { %v379_v32 = vadd.f32 %v378_v31, %v306_v30  ;;  %v449_v33 = vpop.f32.mrf.mxu1  ;;  %v571_v31 = vld [vmem:[%s1494_s9 + $0xa8] sm:$0xff] }
 0x1fd   :  { %v380_v10 = vpop.f32.mrf.mxu0  ;;  %v450_v34 = vadd.f32 %v449_v33, %v306_v30 }
 0x1fe   :  { %v1219_v14 = vmax.f32 %v379_v32, 0.0  ;;  %v381_v35 = vadd.f32 %v380_v10, %v306_v30  ;;  %v451_v36 = vpop.f32.mrf.mxu1  ;;  %v570_v32 = vld [vmem:[%s1494_s9 + $0xa0] sm:$0xff] }
 0x1ff   :  { %v452_v11 = vadd.f32 %v451_v36, %v306_v30  ;;  %v1225_v37 = vmax.f32 %v450_v34, 0.0  ;;  %v573_v36 = vld [vmem:[%s1494_s9 + $0xb8] sm:$0xff] }
 0x200   :  { %v1221_v16 = vmax.f32 %v381_v35, 0.0  ;;  %630 = vrot.lane.b32.xlu1 %v1219_v14, %s879_s6  ;;  %v572_v35 = vld [vmem:[%s1494_s9 + $0xb0] sm:$0xff] }
 0x201   :  { %v1229_v17 = vmax.f32 %v452_v11, 0.0 }
 0x202   :  { %632 = vrot.lane.b32.xlu0 %v1221_v16, %s879_s6 }
 0x204   :  { %634 = vrot.lane.b32.xlu1 %v1225_v37, %s879_s6 }
 0x206   :  { %636 = vrot.lane.b32.xlu0 %v1229_v17, %s879_s6 }
 0x208   :  { %606 = vrot.lane.b32.xlu1 %v1219_v14, %s880_s24 }
 0x20a   :  { %608 = vrot.lane.b32.xlu0 %v1221_v16, %s880_s24 }
 0x20c   :  { %610 = vrot.lane.b32.xlu1 %v1225_v37, %s880_s24 }
 0x20e   :  { %612 = vrot.lane.b32.xlu0 %v1229_v17, %s880_s24 }
 0x210   :  { %582 = vrot.lane.b32.xlu1 %v1219_v14, %s881_s25 }
 0x212   :  { %584 = vrot.lane.b32.xlu0 %v1221_v16, %s881_s25 }
 0x214   :  { %586 = vrot.lane.b32.xlu1 %v1225_v37, %s881_s25 }
 0x216   :  { %588 = vrot.lane.b32.xlu0 %v1229_v17, %s881_s25 }
 0x218   :  { %558 = vrot.lane.b32.xlu1 %v1219_v14, %s882_s0 }
 0x21a   :  { %560 = vrot.lane.b32.xlu0 %v1221_v16, %s882_s0 }
 0x21c   :  { %562 = vrot.lane.b32.xlu1 %v1225_v37, %s882_s0 }
 0x21e   :  { %564 = vrot.lane.b32.xlu0 %v1229_v17, %s882_s0 }
 0x220   :  { %530 = vrot.lane.b32.xlu1 %v1219_v14, %s883_s26 }
 0x222   :  { %532 = vrot.lane.b32.xlu0 %v1221_v16, %s883_s26 }
 0x224   :  { %534 = vrot.lane.b32.xlu1 %v1225_v37, %s883_s26 }
 0x226   :  { %536 = vrot.lane.b32.xlu0 %v1229_v17, %s883_s26 }
 0x228   :  { %506 = vrot.lane.b32.xlu1 %v1219_v14, %s884_s27 }
 0x22a   :  { %508 = vrot.lane.b32.xlu0 %v1221_v16, %s884_s27 }
 0x22c   :  { %510 = vrot.lane.b32.xlu1 %v1225_v37, %s884_s27 }
 0x22e   :  { %512 = vrot.lane.b32.xlu0 %v1229_v17, %s884_s27 }
 0x230   :  { %482 = vrot.lane.b32.xlu1 %v1219_v14, %s885_s28 }
 0x232   :  { %484 = vrot.lane.b32.xlu0 %v1221_v16, %s885_s28 }
 0x234   :  { %486 = vrot.lane.b32.xlu1 %v1225_v37, %s885_s28 }
 0x236   :  { %488 = vrot.lane.b32.xlu0 %v1229_v17, %s885_s28 }
 0x238   :  { %458 = vrot.lane.b32.xlu1 %v1219_v14, %s886_s29 }
 0x23a   :  { %460 = vrot.lane.b32.xlu0 %v1221_v16, %s886_s29 }
 0x23c   :  { %462 = vrot.lane.b32.xlu1 %v1225_v37, %s886_s29 }
 0x23e   :  { %464 = vrot.lane.b32.xlu0 %v1229_v17, %s886_s29 }
 0x240   :  { %694 = vperm.xlu1 %877, %v691_v38  }
 0x272   :  { %v631_v39 = vpop.permute.xlu1 %630 }
 0x274   :  { %v633_v40 = vpop.permute.xlu0 %632 }
 0x275   :  { %v640_v43 = vsel %vm248_vm0, %v631_v39, %v633_v40 }
 0x276   :  { %v635_v44 = vpop.permute.xlu1 %634  ;;  %v646_v50 = vmul.f32 %v642_v42, %v640_v43 }
 0x277   :  { %v639_v45 = vsel %vm248_vm0, %v633_v40, %v635_v44 }
 0x278   :  { %v647_v48 = vmul.f32 %v643_v41, %v639_v45  ;;  %v637_v49 = vpop.permute.xlu0 %636  ;;  %v543_v45 = vld [vmem:[%s1494_s9 + $0x68] sm:$0xff] }
 0x279   :  { %v638_v51 = vsel %vm248_vm0, %v635_v44, %v637_v49  ;;  %v641_v52 = vsel %vm248_vm0, %v637_v49, %v631_v39 }
 0x27a   :  { %v648_v53 = vmul.f32 %v644_v46, %v638_v51  ;;  %v649_v54 = vmul.f32 %v645_v47, %v641_v52  ;;  %714 = vmatprep.subr.mxu0 %v647_v48  ;;  %v607_v55 = vpop.permute.xlu1 %606  ;;  %v544_v51 = vld [vmem:[%s1494_s9 + $0x70] sm:$0xff] }
 0x27b   :  { %715 = vmatpush1.msra.mxu0 %v646_v50  ;;  %v542_v50 = vld [vmem:[%s1494_s9 + $0x60] sm:$0xff] }
 0x27c   :  { %785 = vmatprep.subr.mxu1 %v649_v54  ;;  %v609_v56 = vpop.permute.xlu0 %608 }
 0x27d   :  { %786 = vmatpush1.msra.mxu1 %v648_v53  ;;  %v616_v59 = vsel %vm223_vm1, %v607_v55, %v609_v56 }
 0x27e   :  { %v611_v60 = vpop.permute.xlu1 %610  ;;  %v622_v2 = vmul.f32 %v618_v58, %v616_v59 }
 0x27f   :  { %v615_v61 = vsel %vm223_vm1, %v609_v56, %v611_v60 }
 0x280   :  { %v623_v0 = vmul.f32 %v619_v57, %v615_v61  ;;  %v613_v1 = vpop.permute.xlu0 %612  ;;  %v519_v57 = vld [vmem:[%s1494_s9 + $0x48] sm:$0xff] }
 0x281   :  { %v614_v3 = vsel %vm223_vm1, %v611_v60, %v613_v1  ;;  %v617_v4 = vsel %vm223_vm1, %v613_v1, %v607_v55 }
 0x282   :  { %v624_v5 = vmul.f32 %v620_v62, %v614_v3  ;;  %v625_v6 = vmul.f32 %v621_v63, %v617_v4  ;;  %716 = vmatprep.subr.mxu0 %v623_v0  ;;  %v583_v7 = vpop.permute.xlu1 %582  ;;  %v518_v62 = vld [vmem:[%s1494_s9 + $0x40] sm:$0xff]  ;;  %v521_v63 = vld [vmem:[%s1494_s9 + $0x58] sm:$0xff]  ;;  %v520_v0 = vld [vmem:[%s1494_s9 + $0x50] sm:$0xff] }
 0x283   :  { %717 = vmatpush1.msra.mxu0 %v622_v2 }
 0x284   :  { %v585_v8 = vpop.permute.xlu0 %584  ;;  %787 = vmatprep.subr.mxu1 %v625_v6 }
 0x285   :  { %788 = vmatpush1.msra.mxu1 %v624_v5  ;;  %v592_v13 = vsel %vm198_vm2, %v583_v7, %v585_v8 }
 0x286   :  { %v587_v15 = vpop.permute.xlu1 %586  ;;  %v598_v24 = vmul.f32 %v594_v12, %v592_v13 }
 0x287   :  { %v591_v18 = vsel %vm198_vm2, %v585_v8, %v587_v15 }
 0x288   :  { %v599_v22 = vmul.f32 %v595_v9, %v591_v18  ;;  %v589_v23 = vpop.permute.xlu0 %588  ;;  %v495_v9 = vld [vmem:[%s1494_s9 + $0x28] sm:$0xff] }
 0x289   :  { %v590_v25 = vsel %vm198_vm2, %v587_v15, %v589_v23  ;;  %v593_v26 = vsel %vm198_vm2, %v589_v23, %v583_v7 }
 0x28a   :  { %v600_v27 = vmul.f32 %v596_v19, %v590_v25  ;;  %v601_v28 = vmul.f32 %v597_v21, %v593_v26  ;;  %718 = vmatprep.subr.mxu0 %v599_v22  ;;  %v559_v29 = vpop.permute.xlu1 %558  ;;  %v494_v19 = vld [vmem:[%s1494_s9 + $0x20] sm:$0xff]  ;;  %v497_v21 = vld [vmem:[%s1494_s9 + $0x38] sm:$0xff]  ;;  %v496_v22 = vld [vmem:[%s1494_s9 + $0x30] sm:$0xff] }
 0x28b   :  { %719 = vmatpush1.msra.mxu0 %v598_v24 }
 0x28c   :  { %v561_v30 = vpop.permute.xlu0 %560  ;;  %789 = vmatprep.subr.mxu1 %v601_v28 }
 0x28d   :  { %790 = vmatpush1.msra.mxu1 %v600_v27  ;;  %v568_v33 = vsel %vm173_vm3, %v559_v29, %v561_v30 }
 0x28e   :  { %v563_v10 = vpop.permute.xlu1 %562  ;;  %v574_v39 = vmul.f32 %v570_v32, %v568_v33 }
 0x28f   :  { %v567_v34 = vsel %vm173_vm3, %v561_v30, %v563_v10 }
 0x290   :  { %v575_v11 = vmul.f32 %v571_v31, %v567_v34  ;;  %v565_v38 = vpop.permute.xlu0 %564  ;;  %v471_v31 = vld [vmem:[%s1494_s9 + $0x8] sm:$0xff] }
 0x291   :  { %v566_v40 = vsel %vm173_vm3, %v563_v10, %v565_v38  ;;  %v569_v41 = vsel %vm173_vm3, %v565_v38, %v559_v29 }
 0x292   :  { %v576_v42 = vmul.f32 %v572_v35, %v566_v40  ;;  %v577_v43 = vmul.f32 %v573_v36, %v569_v41  ;;  %720 = vmatprep.subr.mxu0 %v575_v11  ;;  %v531_v44 = vpop.permute.xlu1 %530  ;;  %v470_v35 = vld [vmem:[%s1494_s9] sm:$0xff]  ;;  %v473_v36 = vld [vmem:[%s1494_s9 + $0x18] sm:$0xff]  ;;  %v472_v11 = vld [vmem:[%s1494_s9 + $0x10] sm:$0xff] }
 0x293   :  { %721 = vmatpush1.msra.mxu0 %v574_v39 }
 0x294   :  { %v533_v46 = vpop.permute.xlu0 %532  ;;  %722 = vmatprep.subr.mxu0 %v1221_v16  ;;  %791 = vmatprep.subr.mxu1 %v577_v43  ;;  %v545_v16 = vld [vmem:[%s1494_s9 + $0x78] sm:$0xff] }
 0x295   :  { %v540_v47 = vsel %vm144_vm4, %v531_v44, %v533_v46  ;;  %723 = vmatpush1.msra.mxu0 %v1219_v14  ;;  %792 = vmatpush1.msra.mxu1 %v576_v42 }
 0x296   :  { %v547_v48 = vmul.f32 %v543_v45, %v540_v47  ;;  %793 = vmatprep.subr.mxu1 %v1229_v17  ;;  %v535_v49 = vpop.permute.xlu1 %534 }
 0x297   :  { %794 = vmatpush1.msra.mxu1 %v1225_v37  ;;  %v539_v14 = vsel %vm144_vm4, %v533_v46, %v535_v49 }
 0x298   :  { %v537_v52 = vpop.permute.xlu0 %536  ;;  %724 = vmatprep.subr.mxu0 %v547_v48  ;;  %v548_v56 = vmul.f32 %v544_v51, %v539_v14  ;;  %v848_v51 = vld [vmem:[%s1496_s7 + $0x10] sm:$0xff] }
 0x299   :  { %v538_v37 = vsel %vm144_vm4, %v535_v49, %v537_v52  ;;  %v541_v17 = vsel %vm144_vm4, %v537_v52, %v531_v44  ;;  %v654_v44 = vld [vmem:[%s1495_s3] sm:$0xff] }
 0x29a   :  { %v546_v53 = vmul.f32 %v542_v50, %v541_v17  ;;  %v549_v54 = vmul.f32 %v545_v16, %v538_v37  ;;  %v507_v55 = vpop.permute.xlu1 %506 }
 0x29c   :  { %v509_v58 = vpop.permute.xlu0 %508  ;;  %725 = vmatpush1.msra.mxu0 %v546_v53  ;;  %795 = vmatprep.subr.mxu1 %v549_v54  ;;  %v847_v53 = vld [vmem:[%s1496_s7 + $0x8] sm:$0xff] }
 0x29d   :  { %v516_v59 = vsel %vm119_vm5, %v507_v55, %v509_v58  ;;  %796 = vmatpush1.msra.mxu1 %v548_v56 }
 0x29e   :  { %v523_v60 = vmul.f32 %v519_v57, %v516_v59  ;;  %v511_v61 = vpop.permute.xlu1 %510  ;;  %v849_v57 = vld [vmem:[%s1496_s7 + $0x18] sm:$0xff] }
 0x29f   :  { %v515_v1 = vsel %vm119_vm5, %v509_v58, %v511_v61 }
 0x2a0   :  { %v513_v2 = vpop.permute.xlu0 %512  ;;  %726 = vmatprep.subr.mxu0 %v523_v60  ;;  %v524_v8 = vmul.f32 %v520_v0, %v515_v1 }
 0x2a1   :  { %v514_v3 = vsel %vm119_vm5, %v511_v61, %v513_v2  ;;  %v517_v4 = vsel %vm119_vm5, %v513_v2, %v507_v55 }
 0x2a2   :  { %v522_v5 = vmul.f32 %v518_v62, %v517_v4  ;;  %v525_v6 = vmul.f32 %v521_v63, %v514_v3  ;;  %v483_v7 = vpop.permute.xlu1 %482 }
 0x2a4   :  { %v485_v12 = vpop.permute.xlu0 %484  ;;  %727 = vmatpush1.msra.mxu0 %v522_v5  ;;  %797 = vmatprep.subr.mxu1 %v525_v6 }
 0x2a5   :  { %v492_v13 = vsel %vm94_vm6, %v483_v7, %v485_v12  ;;  %798 = vmatpush1.msra.mxu1 %v524_v8 }
 0x2a6   :  { %v499_v15 = vmul.f32 %v495_v9, %v492_v13  ;;  %v487_v18 = vpop.permute.xlu1 %486 }
 0x2a7   :  { %v491_v23 = vsel %vm94_vm6, %v485_v12, %v487_v18 }
 0x2a8   :  { %v489_v24 = vpop.permute.xlu0 %488  ;;  %728 = vmatprep.subr.mxu0 %v499_v15  ;;  %v500_v30 = vmul.f32 %v496_v22, %v491_v23 }
 0x2a9   :  { %v490_v25 = vsel %vm94_vm6, %v487_v18, %v489_v24  ;;  %v493_v26 = vsel %vm94_vm6, %v489_v24, %v483_v7 }
 0x2aa   :  { %v498_v27 = vmul.f32 %v494_v19, %v493_v26  ;;  %v501_v28 = vmul.f32 %v497_v21, %v490_v25  ;;  %v459_v29 = vpop.permute.xlu1 %458 }
 0x2ac   :  { %v461_v32 = vpop.permute.xlu0 %460  ;;  %729 = vmatpush1.msra.mxu0 %v498_v27  ;;  %799 = vmatprep.subr.mxu1 %v501_v28 }
 0x2ad   :  { %v468_v33 = vsel %vm69_vm7, %v459_v29, %v461_v32  ;;  %800 = vmatpush1.msra.mxu1 %v500_v30 }
 0x2ae   :  { %v475_v10 = vmul.f32 %v471_v31, %v468_v33  ;;  %v463_v34 = vpop.permute.xlu1 %462 }
 0x2af   :  { %v467_v38 = vsel %vm69_vm7, %v461_v32, %v463_v34 }
 0x2b0   :  { %v465_v39 = vpop.permute.xlu0 %464  ;;  %730 = vmatprep.subr.mxu0 %v475_v10  ;;  %v476_v45 = vmul.f32 %v472_v11, %v467_v38 }
 0x2b1   :  { %v466_v40 = vsel %vm69_vm7, %v463_v34, %v465_v39  ;;  %v469_v41 = vsel %vm69_vm7, %v465_v39, %v459_v29 }
 0x2b2   :  { %v474_v42 = vmul.f32 %v470_v35, %v469_v41  ;;  %v477_v43 = vmul.f32 %v473_v36, %v466_v40 }
 0x2b4   :  { %731 = vmatpush1.msra.mxu0 %v474_v42  ;;  %801 = vmatprep.subr.mxu1 %v477_v43 }
 0x2b5   :  { %864 = vmatmul.mubr.msk.f32.vlgmr.msra.gmra.mxu0 %vm308_vm8, %v654_v44  ;;  %802 = vmatpush1.msra.mxu1 %v476_v45 }
 0x2b6   :  { %865 = vmatmul.mubr.msk.f32.vlgmr.msra.gmra.mxu1 %vm308_vm8, %v654_v44 }
 0x2bb   :  { %v695_v46 = vpop.permute.xlu1 %694 }
 0x375   :  { %v766_v47 = vpop.f32.mrf.mxu0 }
 0x376   :  { %v837_v48 = vpop.f32.mrf.mxu1  ;;  %v767_v49 = vadd.f32 %v766_v47, %v695_v46 }
 0x377   :  { %v838_v50 = vadd.f32 %v837_v48, %v695_v46  ;;  %v768_v16 = vpop.f32.mrf.mxu0 }
 0x378   :  { %v842_v14 = vmax.f32 %v767_v49, 0.0  ;;  %v769_v52 = vadd.f32 %v768_v16, %v695_v46  ;;  %v839_v37 = vpop.f32.mrf.mxu1 }
 0x379   :  { %v844_v17 = vmax.f32 %v838_v50, 0.0  ;;  %v840_v54 = vadd.f32 %v839_v37, %v695_v46 }
 0x37a   :  { %v850_v55 = vmul.f32 %v846_v20, %v842_v14  ;;  %v843_v56 = vmax.f32 %v769_v52, 0.0 }
 0x37b   :  { %v852_v58 = vmul.f32 %v848_v51, %v844_v17  ;;  %v845_v59 = vmax.f32 %v840_v54, 0.0 }
 0x37c   :  { %854 = vst [vmem:[%s1497_s10] sm:$0xff] %v850_v55  ;;  %v851_v60 = vmul.f32 %v847_v53, %v843_v56 }
 0x37d   :  { %856 = vst [vmem:[%s1497_s10 + $0x10] sm:$0xff] %v852_v58  ;;  %v853_v61 = vmul.f32 %v849_v57, %v845_v59 }
 0x37e   :  { %855 = vst [vmem:[%s1497_s10 + $0x8] sm:$0xff] %v851_v60 }
 0x37f   :  { %857 = vst [vmem:[%s1497_s10 + $0x18] sm:$0xff] %v853_v61 }

</bundles_post_ra>
